<compile_context>
chip_gen: v5e
topology: v5e:2x2
jax: 0.10.0
libtpu: 0.0.40
codegen_flags: <defaults>
</compile_context>

<pallas_src>
import functools

import jax
import jax.numpy as jnp
from jax import lax
from jax.experimental import pallas as pl
from jax.experimental.pallas import tpu as pltpu


# ----------------------------------------------------------------------------- helpers
def _cdiv(a, b):
    return -(-a // b)


def _round_up(a, b):
    return _cdiv(a, b) * b


def _vmem_limit_bytes():
    """~75% of physical VMEM (headroom for semaphores / DMA descriptors / compiler
    scratch). Falls back to the v7x worst case (64 MiB) if the query fails."""
    try:
        phys = int(pltpu.get_tpu_info().vmem_capacity_bytes)
    except Exception:
        phys = 64 * 1024 * 1024
    return max(32 * 1024 * 1024, (phys * 3) // 4)


def _fused_tile_f(n, f_pad, itemsize, budget):
    """Largest lane-dense feature tile for the whole-batch fused path.

    Per-column footprint of one (n, TILE_F) grid step:
      4 * n * itemsize   : 2x input + 2x output double-buffered io-dtype copies
      2 * n * 4          : ~2 live full-size f32 temporaries (x_f32 / centered)
      ~48                : the (1, TILE_F) running-stat in/out blocks (f32, 2x buffered)
    Returns None when even TILE_F=128 does not fit (caller switches to chunked path).
    """
    per_col = n * (4 * itemsize + 2 * 4) + 48
    tile_f = (budget // per_col // 128) * 128
    if tile_f < 128:
        return None
    tile_f = min(tile_f, f_pad)
    # Rebalance so feature padding waste stays below 128 columns.
    g = _cdiv(f_pad, tile_f)
    return _round_up(_cdiv(f_pad, g), 128)


def _chunked_tiles(n, f_pad, itemsize, budget, target_block_bytes=4 * 1024 * 1024):
    """(tile_n, tile_f) for the batch-tiled stats/normalize (and eval) path.

    tile_f: lane-dense, capped at 1024 then rebalanced against F padding waste.
    tile_n: multiple of 8; sized so the input block is ~target_block_bytes (multi-MiB
    blocks amortize the ~0.35us fixed per-grid-step cost) while the full per-step
    footprint (pipeline copies + f32 temporaries) stays within the VMEM budget.
    """
    tile_f = min(f_pad, 1024)
    g = _cdiv(f_pad, tile_f)
    tile_f = _round_up(_cdiv(f_pad, g), 128)

    per_row = tile_f * (4 * itemsize + 2 * 4) + 48
    fit_rows = max(8, budget // per_row)
    want_rows = max(8, target_block_bytes // (tile_f * itemsize))
    tile_n = min(fit_rows, want_rows, _round_up(n, 8))
    tile_n = max(8, (tile_n // 8) * 8)
    return tile_n, tile_f


def _pad_stats(rm, rv, pad_f):
    if pad_f:
        rm = jnp.pad(rm, ((0, 0), (0, pad_f)))
        rv = jnp.pad(rv, ((0, 0), (0, pad_f)), constant_values=1.0)
    return rm, rv


# ----------------------------------------------------------------------------- kernels
def _fused_train_kernel(x_ref, rm_ref, rv_ref, y_ref, new_rm_ref, new_rv_ref,
                        *, momentum, eps):
    """Whole-batch block: exact two-pass (centered) variance, one read + one write of x."""
    xf = x_ref[...].astype(jnp.float32)
    inv_n = 1.0 / x_ref.shape[0]
    batch_mean = jnp.sum(xf, axis=0, keepdims=True) * inv_n          # (1, TILE_F)
    centered = xf - batch_mean
    batch_var = jnp.sum(centered * centered, axis=0, keepdims=True) * inv_n
    inv_std = lax.rsqrt(batch_var + eps)                             # EUP, (1, TILE_F)
    y_ref[...] = (centered * inv_std).astype(y_ref.dtype)            # broadcast multiply
    new_rm_ref[...] = ((1.0 - momentum) * rm_ref[...].astype(jnp.float32)
                       + momentum * batch_mean).astype(new_rm_ref.dtype)
    new_rv_ref[...] = ((1.0 - momentum) * rv_ref[...].astype(jnp.float32)
                       + momentum * batch_var).astype(new_rv_ref.dtype)


def _stats_kernel(x_ref, rm_ref, rv_ref, mean_ref, var_ref, new_rm_ref, new_rv_ref,
                  *, inv_n, momentum):
    """Batch-tiled statistics: accumulate per-feature sum / sum-of-squares directly in
    the resident (1, TILE_F) output blocks across the 'arbitrary' batch-chunk axis."""
    k = pl.program_id(1)

    @pl.when(k == 0)
    def _init():
        mean_ref[...] = jnp.zeros_like(mean_ref)
        var_ref[...] = jnp.zeros_like(var_ref)

    xf = x_ref[...].astype(jnp.float32)
    mean_ref[...] += jnp.sum(xf, axis=0, keepdims=True)
    var_ref[...] += jnp.sum(xf * xf, axis=0, keepdims=True)

    @pl.when(k == pl.num_programs(1) - 1)
    def _finalize():
        m = mean_ref[...] * inv_n
        v = jnp.maximum(var_ref[...] * inv_n - m * m, 0.0)           # biased variance
        mean_ref[...] = m
        var_ref[...] = v
        new_rm_ref[...] = ((1.0 - momentum) * rm_ref[...].astype(jnp.float32)
                           + momentum * m).astype(new_rm_ref.dtype)
        new_rv_ref[...] = ((1.0 - momentum) * rv_ref[...].astype(jnp.float32)
                           + momentum * v).astype(new_rv_ref.dtype)


def _normalize_kernel(x_ref, m_ref, v_ref, y_ref, *, eps):
    """y = (x - m) * rsqrt(v + eps); used for eval mode and the chunked-train 2nd pass."""
    inv_std = lax.rsqrt(v_ref[...].astype(jnp.float32) + eps)        # (1, TILE_F)
    y_ref[...] = ((x_ref[...].astype(jnp.float32) - m_ref[...].astype(jnp.float32))
                  * inv_std).astype(y_ref.dtype)


# ---------------------------------------------------------------------------- runners
def _run_fused_train(x, rm, rv, n, f, tile_f, momentum, eps, vmem_limit):
    f_tot = _round_up(max(f, tile_f), tile_f)
    pad_f = f_tot - f
    if pad_f:
        x = jnp.pad(x, ((0, 0), (0, pad_f)))
    rm, rv = _pad_stats(rm, rv, pad_f)

    x_spec = pl.BlockSpec((n, tile_f), lambda j: (0, j))
    s_spec = pl.BlockSpec((1, tile_f), lambda j: (0, j))
    kern = functools.partial(_fused_train_kernel, momentum=momentum, eps=eps)

    y, new_rm, new_rv = pl.pallas_call(
        kern,
        grid=(f_tot // tile_f,),
        in_specs=[x_spec, s_spec, s_spec],
        out_specs=(x_spec, s_spec, s_spec),
        out_shape=(
            jax.ShapeDtypeStruct((n, f_tot), x.dtype),
            jax.ShapeDtypeStruct((1, f_tot), rm.dtype),
            jax.ShapeDtypeStruct((1, f_tot), rv.dtype),
        ),
        # In-place running-stat update (mirrors the PyTorch buffer overwrite).
        input_output_aliases={1: 1, 2: 2},
        compiler_params=pltpu.CompilerParams(
            dimension_semantics=("parallel",),
            vmem_limit_bytes=vmem_limit),
    )(x, rm, rv)

    if pad_f:
        y, new_rm, new_rv = y[:, :f], new_rm[:, :f], new_rv[:, :f]
    return y, new_rm, new_rv


def _run_chunked_train(x, rm, rv, n, f, tile_n, tile_f, momentum, eps, vmem_limit):
    f_tot = _round_up(max(f, tile_f), tile_f)
    n_tot = _round_up(max(n, tile_n), tile_n)
    pad_f, pad_n = f_tot - f, n_tot - n
    if pad_f or pad_n:
        x = jnp.pad(x, ((0, pad_n), (0, pad_f)))   # zero pad: does not perturb sum/sumsq
    rm, rv = _pad_stats(rm, rv, pad_f)

    grid = (f_tot // tile_f, n_tot // tile_n)
    x_spec = pl.BlockSpec((tile_n, tile_f), lambda j, k: (k, j))
    s_spec = pl.BlockSpec((1, tile_f), lambda j, k: (0, j))

    stats_kern = functools.partial(_stats_kernel, inv_n=1.0 / n, momentum=momentum)
    mean, var, new_rm, new_rv = pl.pallas_call(
        stats_kern,
        grid=grid,
        in_specs=[x_spec, s_spec, s_spec],
        out_specs=(s_spec, s_spec, s_spec, s_spec),
        out_shape=(
            jax.ShapeDtypeStruct((1, f_tot), jnp.float32),
            jax.ShapeDtypeStruct((1, f_tot), jnp.float32),
            jax.ShapeDtypeStruct((1, f_tot), rm.dtype),
            jax.ShapeDtypeStruct((1, f_tot), rv.dtype),
        ),
        input_output_aliases={1: 2, 2: 3},
        compiler_params=pltpu.CompilerParams(
            dimension_semantics=("parallel", "arbitrary"),
            vmem_limit_bytes=vmem_limit),
    )(x, rm, rv)

    norm_kern = functools.partial(_normalize_kernel, eps=eps)
    y = pl.pallas_call(
        norm_kern,
        grid=grid,
        in_specs=[x_spec, s_spec, s_spec],
        out_specs=x_spec,
        out_shape=jax.ShapeDtypeStruct((n_tot, f_tot), x.dtype),
        compiler_params=pltpu.CompilerParams(
            dimension_semantics=("parallel", "parallel"),
            vmem_limit_bytes=vmem_limit),
    )(x, mean, var)

    y = y[:n, :f]
    if pad_f:
        new_rm, new_rv = new_rm[:, :f], new_rv[:, :f]
    return y, new_rm, new_rv


def _run_eval(x, rm, rv, n, f, tile_n, tile_f, eps, vmem_limit):
    f_tot = _round_up(max(f, tile_f), tile_f)
    n_tot = _round_up(max(n, tile_n), tile_n)
    pad_f, pad_n = f_tot - f, n_tot - n
    if pad_f or pad_n:
        x = jnp.pad(x, ((0, pad_n), (0, pad_f)))
    rm, rv = _pad_stats(rm, rv, pad_f)

    grid = (f_tot // tile_f, n_tot // tile_n)
    x_spec = pl.BlockSpec((tile_n, tile_f), lambda j, k: (k, j))
    s_spec = pl.BlockSpec((1, tile_f), lambda j, k: (0, j))

    kern = functools.partial(_normalize_kernel, eps=eps)
    y = pl.pallas_call(
        kern,
        grid=grid,
        in_specs=[x_spec, s_spec, s_spec],
        out_specs=x_spec,
        out_shape=jax.ShapeDtypeStruct((n_tot, f_tot), x.dtype),
        compiler_params=pltpu.CompilerParams(
            dimension_semantics=("parallel", "parallel"),
            vmem_limit_bytes=vmem_limit),
    )(x, rm, rv)
    return y[:n, :f]


# ----------------------------------------------------------------------------- wrapper
def online_normalizer_forward(x, running_mean, running_var, num_batches_tracked,
                              *, momentum=0.01, eps=1e-6, training=True,
                              feature_tile=None, batch_tile=None):
    """Forward pass of OnlineNormalizer.

    Args:
      x: (N, F) input.
      running_mean, running_var: (F,) or (1, F) running statistics.
      num_batches_tracked: integer scalar.
      feature_tile / batch_tile: optional tiling overrides (feature_tile must be a
        multiple of 128; passing batch_tile forces the batch-tiled training path).
    Returns:
      (y, new_running_mean, new_running_var, new_num_batches_tracked)
      running stats returned with shape (1, F) (PyTorch keepdim-broadcast buffers).
    """
    n, f = x.shape
    rm = jnp.asarray(running_mean).reshape(1, f)
    rv = jnp.asarray(running_var).reshape(1, f)

    itemsize = jnp.dtype(x.dtype).itemsize
    vmem_limit = _vmem_limit_bytes()
    budget = vmem_limit - 2 * 1024 * 1024          # reserve for misc allocations
    f128 = _round_up(f, 128)

    if feature_tile is not None:
        assert feature_tile % 128 == 0, "feature_tile must be a multiple of 128"
    if batch_tile is not None:
        assert batch_tile % 8 == 0, "batch_tile must be a multiple of 8"

    if training:
        use_fused = batch_tile is None
        tile_f = None
        if use_fused:
            tile_f = feature_tile if feature_tile is not None else _fused_tile_f(
                n, f128, itemsize, budget)
            if tile_f is None:                     # whole-batch block cannot fit VMEM
                use_fused = False
        if use_fused:
            y, new_rm, new_rv = _run_fused_train(
                x, rm, rv, n, f, tile_f, momentum, eps, vmem_limit)
        else:
            tn_auto, tf_auto = _chunked_tiles(n, f128, itemsize, budget)
            tile_n = batch_tile if batch_tile is not None else tn_auto
            tile_f = feature_tile if feature_tile is not None else tf_auto
            y, new_rm, new_rv = _run_chunked_train(
                x, rm, rv, n, f, tile_n, tile_f, momentum, eps, vmem_limit)
        return y, new_rm, new_rv, num_batches_tracked + 1

    tn_auto, tf_auto = _chunked_tiles(n, f128, itemsize, budget)
    tile_n = batch_tile if batch_tile is not None else tn_auto
    tile_f = feature_tile if feature_tile is not None else tf_auto
    y = _run_eval(x, rm, rv, n, f, tile_n, tile_f, eps, vmem_limit)
    return y, rm, rv, num_batches_tracked


# -------------------------------------------------------------------------------- demo
if __name__ == "__main__":
    key = jax.random.PRNGKey(0)
    momentum, eps = 0.01, 1e-6

    def ref_train(x, rm, rv):
        bm = jnp.mean(x, axis=0, keepdims=True)
        bv = jnp.mean((x - bm) ** 2, axis=0, keepdims=True)   # biased, like unbiased=False
        y = (x - bm) / jnp.sqrt(bv + eps)
        return (y,
                (1.0 - momentum) * rm + momentum * bm,
                (1.0 - momentum) * rv + momentum * bv)

    cases = [
        ((8, 384), {}),                              # fused path, auto single lane-dense tile
        ((8, 384), dict(feature_tile=128)),          # fused path, multi-tile feature grid
        ((8, 200), {}),                              # non-128-aligned F -> padded lane-dense tiles
        ((32, 256), dict(batch_tile=8)),             # batch-tiled stats + normalize path
    ]
    for (batch, num_features), kwargs in cases:
        key, kx = jax.random.split(key)
        x = jax.random.normal(kx, (batch, num_features), dtype=jnp.float32) * 2.0 + 0.5

        rm0 = jnp.zeros((1, num_features), dtype=jnp.float32)
        rv0 = jnp.ones((1, num_features), dtype=jnp.float32)
        nbt0 = jnp.array(0, dtype=jnp.int32)

        # References computed before the (aliased) training call.
        y_want, rm_want, rv_want = ref_train(x, rm0, rv0)

        y, new_rm, new_rv, nbt = online_normalizer_forward(
            x, rm0, rv0, nbt0, momentum=momentum, eps=eps, training=True, **kwargs)
        jax.block_until_ready((y, new_rm, new_rv))

        assert y.shape == x.shape and new_rm.shape == (1, num_features)
        assert jnp.allclose(y, y_want, atol=1e-4, rtol=1e-4), (batch, num_features, kwargs)
        assert jnp.allclose(new_rm, rm_want, atol=1e-5, rtol=1e-5), (batch, num_features)
        assert jnp.allclose(new_rv, rv_want, atol=1e-5, rtol=1e-5), (batch, num_features)
        assert int(nbt) == 1

        # Eval-mode forward using the freshly updated running stats.
        y_ev_want = (x - new_rm) / jnp.sqrt(new_rv + eps)
        y_ev, _, _, nbt2 = online_normalizer_forward(
            x, new_rm, new_rv, nbt, momentum=momentum, eps=eps, training=False)
        jax.block_until_ready(y_ev)
        assert jnp.allclose(y_ev, y_ev_want, atol=1e-4, rtol=1e-4), (batch, num_features)
        assert int(nbt2) == 1

    print("KERNEL_OK")
</pallas_src>

<mosaic_0001>
module attributes {stable_mosaic.version = 11 : i64} {
  func.func @_fused_train_kernel(%arg0: i32, %arg1: memref<8x384xf32, #tpu.memory_space<vmem>>, %arg2: memref<1x384xf32, #tpu.memory_space<vmem>>, %arg3: memref<1x384xf32, #tpu.memory_space<vmem>>, %arg4: memref<8x384xf32, #tpu.memory_space<vmem>>, %arg5: memref<1x384xf32, #tpu.memory_space<vmem>>, %arg6: memref<1x384xf32, #tpu.memory_space<vmem>>) attributes {dimension_semantics = [#tpu.dimension_semantics<parallel>], iteration_bounds = array<i64: 1>, scalar_prefetch = 0 : i64, scratch_operands = 0 : i64, tpu.core_type = #tpu.core_type<tc>, window_params = [{transform_indices = @transform_0, window_bounds = array<i64: 8, 384>}, {transform_indices = @transform_1, window_bounds = array<i64: 1, 384>}, {transform_indices = @transform_2, window_bounds = array<i64: 1, 384>}, {transform_indices = @transform_3, window_bounds = array<i64: 8, 384>}, {transform_indices = @transform_4, window_bounds = array<i64: 1, 384>}, {transform_indices = @transform_5, window_bounds = array<i64: 1, 384>}]} {
    %c0 = arith.constant 0 : index
    %c0_0 = arith.constant 0 : index
    %0 = vector.load %arg1[%c0, %c0_0] : memref<8x384xf32, #tpu.memory_space<vmem>>, vector<8x384xf32>
    %cst = arith.constant dense<0.000000e+00> : vector<384xf32>
    %1 = vector.multi_reduction <add>, %0, %cst [0] : vector<8x384xf32> to vector<384xf32>
    %2 = vector.shape_cast %1 : vector<384xf32> to vector<1x384xf32>
    %cst_1 = arith.constant 1.250000e-01 : f32
    %3 = vector.broadcast %cst_1 : f32 to vector<1x384xf32>
    %4 = arith.mulf %2, %3 : vector<1x384xf32>
    %5 = vector.broadcast %4 : vector<1x384xf32> to vector<8x384xf32>
    %6 = arith.subf %0, %5 : vector<8x384xf32>
    %7 = arith.mulf %6, %6 : vector<8x384xf32>
    %cst_2 = arith.constant dense<0.000000e+00> : vector<384xf32>
    %8 = vector.multi_reduction <add>, %7, %cst_2 [0] : vector<8x384xf32> to vector<384xf32>
    %9 = vector.shape_cast %8 : vector<384xf32> to vector<1x384xf32>
    %cst_3 = arith.constant 1.250000e-01 : f32
    %10 = vector.broadcast %cst_3 : f32 to vector<1x384xf32>
    %11 = arith.mulf %9, %10 : vector<1x384xf32>
    %cst_4 = arith.constant 9.99999997E-7 : f32
    %12 = vector.broadcast %cst_4 : f32 to vector<1x384xf32>
    %13 = arith.addf %11, %12 : vector<1x384xf32>
    %14 = math.rsqrt %13 : vector<1x384xf32>
    %15 = vector.broadcast %14 : vector<1x384xf32> to vector<8x384xf32>
    %16 = arith.mulf %6, %15 : vector<8x384xf32>
    %c0_5 = arith.constant 0 : index
    %c0_6 = arith.constant 0 : index
    %17 = vector.load %arg4[%c0_5, %c0_6] : memref<8x384xf32, #tpu.memory_space<vmem>>, vector<8x384xf32>
    tpu.vector_store %arg4[%c0_5, %c0_6], %16 {strides = array<i32>} : memref<8x384xf32, #tpu.memory_space<vmem>>, vector<8x384xf32>,
    %c0_7 = arith.constant 0 : index
    %c0_8 = arith.constant 0 : index
    %18 = vector.load %arg2[%c0_7, %c0_8] : memref<1x384xf32, #tpu.memory_space<vmem>>, vector<1x384xf32>
    %cst_9 = arith.constant 9.900000e-01 : f32
    %19 = vector.broadcast %cst_9 : f32 to vector<1x384xf32>
    %20 = arith.mulf %19, %18 : vector<1x384xf32>
    %cst_10 = arith.constant 0.00999999977 : f32
    %21 = vector.broadcast %cst_10 : f32 to vector<1x384xf32>
    %22 = arith.mulf %21, %4 : vector<1x384xf32>
    %23 = arith.addf %20, %22 : vector<1x384xf32>
    %c0_11 = arith.constant 0 : index
    %c0_12 = arith.constant 0 : index
    %24 = vector.load %arg5[%c0_11, %c0_12] : memref<1x384xf32, #tpu.memory_space<vmem>>, vector<1x384xf32>
    tpu.vector_store %arg5[%c0_11, %c0_12], %23 {strides = array<i32>} : memref<1x384xf32, #tpu.memory_space<vmem>>, vector<1x384xf32>,
    %c0_13 = arith.constant 0 : index
    %c0_14 = arith.constant 0 : index
    %25 = vector.load %arg3[%c0_13, %c0_14] : memref<1x384xf32, #tpu.memory_space<vmem>>, vector<1x384xf32>
    %cst_15 = arith.constant 9.900000e-01 : f32
    %26 = vector.broadcast %cst_15 : f32 to vector<1x384xf32>
    %27 = arith.mulf %26, %25 : vector<1x384xf32>
    %cst_16 = arith.constant 0.00999999977 : f32
    %28 = vector.broadcast %cst_16 : f32 to vector<1x384xf32>
    %29 = arith.mulf %28, %11 : vector<1x384xf32>
    %30 = arith.addf %27, %29 : vector<1x384xf32>
    %c0_17 = arith.constant 0 : index
    %c0_18 = arith.constant 0 : index
    %31 = vector.load %arg6[%c0_17, %c0_18] : memref<1x384xf32, #tpu.memory_space<vmem>>, vector<1x384xf32>
    tpu.vector_store %arg6[%c0_17, %c0_18], %30 {strides = array<i32>} : memref<1x384xf32, #tpu.memory_space<vmem>>, vector<1x384xf32>,
    return
  }
  func.func @transform_0(%arg0: i32) -> (i32, i32) {
    %c0_i32 = arith.constant 0 : i32
    %c0_i32_0 = arith.constant 0 : i32
    return %c0_i32, %arg0 : i32, i32
  }
  func.func @transform_1(%arg0: i32) -> (i32, i32) {
    %c0_i32 = arith.constant 0 : i32
    %c0_i32_0 = arith.constant 0 : i32
    return %c0_i32, %arg0 : i32, i32
  }
  func.func @transform_2(%arg0: i32) -> (i32, i32) {
    %c0_i32 = arith.constant 0 : i32
    %c0_i32_0 = arith.constant 0 : i32
    return %c0_i32, %arg0 : i32, i32
  }
  func.func @transform_3(%arg0: i32) -> (i32, i32) {
    %c0_i32 = arith.constant 0 : i32
    %c0_i32_0 = arith.constant 0 : i32
    return %c0_i32, %arg0 : i32, i32
  }
  func.func @transform_4(%arg0: i32) -> (i32, i32) {
    %c0_i32 = arith.constant 0 : i32
    %c0_i32_0 = arith.constant 0 : i32
    return %c0_i32, %arg0 : i32, i32
  }
  func.func @transform_5(%arg0: i32) -> (i32, i32) {
    %c0_i32 = arith.constant 0 : i32
    %c0_i32_0 = arith.constant 0 : i32
    return %c0_i32, %arg0 : i32, i32
  }
}

</mosaic_0001>

<bundles_post_ra>
// kernel: tpu_custom_call.1
= control target key start
LH: loop header
LB: loop body
LE: loop exit
PB: predicated region body
PF: predicated region fallthrough
CT: control target
= control target key end

     0   :  { %11 = vsyncpa [#allocation3], 0  ;;  %s480_s0 = inlined_call_operand.hbm [shape: f32[8,384], index: 0, kind: input, shape index: {}]   ;;  %s481_s1 = inlined_call_operand.hbm [shape: f32[1,384], index: 1, kind: input, shape index: {}, may-alias: {1,4}]   ;;  %s482_s2 = inlined_call_operand.hbm [shape: f32[1,384], index: 2, kind: input, shape index: {}, may-alias: {2,5}]   ;;  %s483_s3 = inlined_call_operand.hbm [shape: f32[8,384], index: 3, kind: output, shape index: {0}]   ;;  %s484_s4 = inlined_call_operand.hbm [shape: f32[1,384], index: 4, kind: output, shape index: {1}, may-alias: {1,4}]   ;;  %s485_s5 = inlined_call_operand.hbm [shape: f32[1,384], index: 5, kind: output, shape index: {2}, may-alias: {2,5}]  }
   0x1   :  { %12 = vsyncpa [#allocation6], 0 }
   0x2   :  { %13 = vsyncpa [#allocation4], 0  ;;  %s31_s20 = sshll.u32 %s481_s1, 4  ;;  %s32_s20 = int_to_ptr.hbm [resolvable:$true] %s31_s20 }
   0x3   :  { %14 = vsyncpa [#allocation10], 0  ;;  %s399_s21 = smov [#allocation5]   ;;  %s20_s25 = sshll.u32 %s480_s0, 4  ;;  %s21_s25 = int_to_ptr.hbm [resolvable:$true] %s20_s25 }
   0x4   :  { %s33_s22 = sshll.u32 %s399_s21, 4  ;;  %s400_s26 = smov [#allocation2]   ;;  %s34_s22 = int_to_ptr.vmem [resolvable:$true] %s33_s22 }
   0x5   :  { %36 = dma.hbm_to_vmem [thread:$0]  %s32_s20, 48, %s34_s22, [#allocation6]  }
   0x6   :  { %s22_s27 = sshll.u32 %s400_s26, 4  ;;  %s42_s30 = sshll.u32 %s482_s2, 4  ;;  %s23_s27 = int_to_ptr.vmem [resolvable:$true] %s22_s27  ;;  %s43_s30 = int_to_ptr.hbm [resolvable:$true] %s42_s30 }
   0x7   :  { %25 = dma.hbm_to_vmem [thread:$0]  %s21_s25, 384, %s23_s27, [#allocation3]  }
   0x8   :  { %s401_s1 = smov [#allocation7]  }
   0x9   :  { %s44_s6 = sshll.u32 %s401_s1, 4  ;;  %s45_s6 = int_to_ptr.vmem [resolvable:$true] %s44_s6 }
   0xa   :  { %47 = dma.hbm_to_vmem [thread:$0]  %s43_s30, 48, %s45_s6, [#allocation6]  }
   0xb   :  { %391 = dma.done.wait [#allocation3], 384  }
   0xc   :  { %392 = vsyncadd [#allocation3], 4294966912 }
   0xd   :  { %393 = dma.done.wait [#allocation6], 96  }
   0xe   :  { %394 = vsyncadd [#allocation6], 4294967200  ;;  %v60_v0 = vld [vmem:[#allocation2] sm:$0xff]  ;;  %v61_v1 = vld [vmem:[#allocation2 + $0x8] sm:$0xff]  ;;  %vm160_vm0 = vcmask 1040384   ;;  %vm162_vm1 = vcmask 1041408   ;;  %v166_v29 = vlaneseq }
   0xf   :  { %v62_v2 = vld [vmem:[#allocation2 + $0x10] sm:$0xff]  ;;  %v63_v3 = vrot.slane %v60_v0, 4  ;;  %v69_v4 = vrot.slane %v61_v1, 4  ;;  %v150_v24 = vld [vmem:[#allocation5] sm:$0x7]  ;;  %s402_s0 = smov [#allocation9]  }
  0x10   :  { %v75_v5 = vrot.slane %v62_v2, 4  ;;  %v151_v32 = vmul.f32 0.99, %v150_v24  ;;  %s202_s2 = sshll.u32 %s402_s0, 4  ;;  %s204_s9 = sshll.u32 %s484_s4, 4  ;;  %vm461_vm2 = vcmp.lt.s32.totalorder %v166_v29, 384  ;;  %s203_s2 = int_to_ptr.vmem [resolvable:$true] %s202_s2  ;;  %s205_s9 = int_to_ptr.hbm [resolvable:$true] %s204_s9 }
  0x11   :  { %v64_v6 = vadd.f32 %v63_v3, %v60_v0  ;;  %v70_v7 = vadd.f32 %v69_v4, %v61_v1  ;;  %s403_s4 = smov [#allocation11]   ;;  %s215_s13 = sshll.u32 %s485_s5, 4  ;;  %s216_s13 = int_to_ptr.hbm [resolvable:$true] %s215_s13 }
  0x12   :  { %v76_v8 = vadd.f32 %v75_v5, %v62_v2  ;;  %s213_s10 = sshll.u32 %s403_s4, 4  ;;  %s404_s5 = smov [#allocation8]   ;;  %s214_s10 = int_to_ptr.vmem [resolvable:$true] %s213_s10 }
  0x13   :  { %v65_v9 = vrot.slane %v64_v6, 2  ;;  %v71_v10 = vrot.slane %v70_v7, 2  ;;  %s191_s14 = sshll.u32 %s404_s5, 4  ;;  %s193_s17 = sshll.u32 %s483_s3, 4  ;;  %s192_s14 = int_to_ptr.vmem [resolvable:$true] %s191_s14  ;;  %s194_s17 = int_to_ptr.hbm [resolvable:$true] %s193_s17 }
  0x14   :  { %v77_v11 = vrot.slane %v76_v8, 2 }
  0x15   :  { %v66_v12 = vadd.f32 %v65_v9, %v64_v6  ;;  %v72_v13 = vadd.f32 %v71_v10, %v70_v7 }
  0x16   :  { %v78_v14 = vadd.f32 %v77_v11, %v76_v8 }
  0x17   :  { %v67_v15 = vrot.slane %v66_v12, 1  ;;  %v73_v16 = vrot.slane %v72_v13, 1 }
  0x18   :  { %v79_v17 = vrot.slane %v78_v14, 1 }
  0x19   :  { %v68_v18 = vadd.f32 %v67_v15, %v66_v12  ;;  %v74_v19 = vadd.f32 %v73_v16, %v72_v13 }
  0x1a   :  { %v80_v20 = vadd.f32 %v79_v17, %v78_v14 }
  0x1b   :  { %v81_v21 = vmul.f32 0.125, %v68_v18  ;;  %v82_v22 = vmul.f32 0.125, %v74_v19 }
  0x1c   :  { %v83_v23 = vmul.f32 0.125, %v80_v20 }
  0x1d   :  { %v152_v25 = vmul.f32 0.01, %v81_v21  ;;  %v153_v26 = vmul.f32 0.01, %v82_v22  ;;  %v444_v28 = vsub.f32 %v60_v0, %v81_v21  ;;  %v446_v30 = vsub.f32 %v61_v1, %v82_v22  ;;  %v171_v0 = vld [vmem:[#allocation7] sm:$0x7] }
  0x1e   :  { %v154_v27 = vmul.f32 0.01, %v83_v23  ;;  %v448_v31 = vsub.f32 %v62_v2, %v83_v23  ;;  %v172_v6 = vmul.f32 0.99, %v171_v0 }
  0x1f   :  { %v158_v33 = vrot.slane %v153_v26, 7  ;;  %v87_v35 = vmul.f32 %v444_v28, %v444_v28  ;;  %v88_v36 = vmul.f32 %v446_v30, %v446_v30 }
  0x20   :  { %v159_v34 = vrot.slane %v154_v27, 6  ;;  %v89_v37 = vmul.f32 %v448_v31, %v448_v31 }
  0x21   :  { %v161_v38 = vsel %vm160_vm0, %v152_v25, %v158_v33  ;;  %v90_v39 = vrot.slane %v87_v35, 4  ;;  %v96_v42 = vrot.slane %v88_v36, 4 }
  0x22   :  { %v163_v40 = vsel %vm162_vm1, %v161_v38, %v159_v34  ;;  %v102_v43 = vrot.slane %v89_v37, 4 }
  0x23   :  { %v165_v44 = vadd.f32 %v163_v40, %v151_v32  ;;  %v91_v45 = vadd.f32 %v90_v39, %v87_v35  ;;  %v97_v46 = vadd.f32 %v96_v42, %v88_v36 }
  0x24   :  { %v103_v47 = vadd.f32 %v102_v43, %v89_v37 }
  0x25   :  { %170 = vst.msk [vmem:[#allocation9] sm:$0x7] %vm461_vm2, %v165_v44  ;;  %v92_v48 = vrot.slane %v91_v45, 2  ;;  %v98_v49 = vrot.slane %v97_v46, 2 }
  0x26   :  { %v104_v50 = vrot.slane %v103_v47, 2  ;;  %207 = dma.vmem_to_hbm [thread:$0]  %s203_s2, 48, %s205_s9, [#allocation10]  }
  0x27   :  { %v93_v51 = vadd.f32 %v92_v48, %v91_v45  ;;  %v99_v52 = vadd.f32 %v98_v49, %v97_v46 }
  0x28   :  { %v105_v53 = vadd.f32 %v104_v50, %v103_v47 }
  0x29   :  { %v94_v54 = vrot.slane %v93_v51, 1  ;;  %v100_v55 = vrot.slane %v99_v52, 1 }
  0x2a   :  { %v106_v56 = vrot.slane %v105_v53, 1 }
  0x2b   :  { %v95_v57 = vadd.f32 %v94_v54, %v93_v51  ;;  %v101_v58 = vadd.f32 %v100_v55, %v99_v52 }
  0x2c   :  { %v107_v59 = vadd.f32 %v106_v56, %v105_v53 }
  0x2d   :  { %v108_v60 = vmul.f32 0.125, %v95_v57  ;;  %v109_v61 = vmul.f32 0.125, %v101_v58 }
  0x2e   :  { %v110_v62 = vmul.f32 0.125, %v107_v59 }
  0x2f   :  { %v111_v63 = vadd.f32 1e-06, %v108_v60  ;;  %v173_v1 = vmul.f32 0.01, %v108_v60  ;;  %v112_v2 = vadd.f32 1e-06, %v109_v61 }
  0x30   :  { %v113_v3 = vadd.f32 1e-06, %v110_v62  ;;  %v174_v4 = vmul.f32 0.01, %v109_v61  ;;  %v175_v5 = vmul.f32 0.01, %v110_v62 }
  0x31   :  { %241 = vrsqrt.f32 %v111_v63  ;;  %vm120_vm3 = vweird.f32 %v111_v63  ;;  %vm130_vm5 = vweird.f32 %v112_v2 }
  0x32   :  { %243 = vrsqrt.f32 %v112_v2  ;;  %v179_v7 = vrot.slane %v174_v4, 7  ;;  %v180_v8 = vrot.slane %v175_v5, 6  ;;  %vm140_vm7 = vweird.f32 %v113_v3 }
  0x33   :  { %245 = vrsqrt.f32 %v113_v3 }
  0x34   :  { %v181_v9 = vsel %vm160_vm0, %v173_v1, %v179_v7 }
  0x35   :  { %v182_v10 = vsel %vm162_vm1, %v181_v9, %v180_v8 }
  0x36   :  { %v184_v11 = vadd.f32 %v182_v10, %v172_v6 }
  0x37   :  { %v242_v12 = vpop.eup %241 }
  0x38   :  { %v244_v13 = vpop.eup %243  ;;  %v115_v14 = vmul.f32 %v242_v12, %v111_v63  ;;  %185 = vst.msk [vmem:[#allocation11] sm:$0x7] %vm461_vm2, %v184_v11  ;;  %vm121_vm4 = vweird.f32 %v242_v12 }
  0x39   :  { %v246_v15 = vpop.eup %245  ;;  %v125_v16 = vmul.f32 %v244_v13, %v112_v2  ;;  %218 = dma.vmem_to_hbm [thread:$0]  %s214_s10, 48, %s216_s13, [#allocation10]   ;;  %vm131_vm6 = vweird.f32 %v244_v13  ;;  %vm122_vm9 = vmor %vm120_vm3, %vm121_vm4 }
  0x3a   :  { %v116_v17 = vmul.f32 %v242_v12, %v115_v14  ;;  %v135_v18 = vmul.f32 %v246_v15, %v113_v3  ;;  %vm141_vm8 = vweird.f32 %v246_v15  ;;  %vm132_vm10 = vmor %vm130_vm5, %vm131_vm6 }
  0x3b   :  { %v126_v19 = vmul.f32 %v244_v13, %v125_v16  ;;  %vm142_vm11 = vmor %vm140_vm7, %vm141_vm8 }
  0x3c   :  { %v117_v20 = vmul.f32 0.5, %v116_v17  ;;  %v136_v21 = vmul.f32 %v246_v15, %v135_v18 }
  0x3d   :  { %v127_v22 = vmul.f32 0.5, %v126_v19 }
  0x3e   :  { %v118_v23 = vsub.f32 1.5, %v117_v20  ;;  %v137_v24 = vmul.f32 0.5, %v136_v21 }
  0x3f   :  { %v128_v25 = vsub.f32 1.5, %v127_v22 }
  0x40   :  { %v119_v26 = vmul.f32 %v242_v12, %v118_v23  ;;  %v138_v27 = vsub.f32 1.5, %v137_v24 }
  0x41   :  { %v129_v29 = vmul.f32 %v244_v13, %v128_v25 }
  0x42   :  { %v123_v32 = vsel %vm122_vm9, %v242_v12, %v119_v26  ;;  %v139_v33 = vmul.f32 %v246_v15, %v138_v27 }
  0x43   :  { %v144_v34 = vmul.f32 %v123_v32, %v444_v28  ;;  %v133_v35 = vsel %vm132_vm10, %v244_v13, %v129_v29 }
  0x44   :  { %v145_v36 = vmul.f32 %v133_v35, %v446_v30  ;;  %v143_v37 = vsel %vm142_vm11, %v246_v15, %v139_v33 }
  0x45   :  { %147 = vst [vmem:[#allocation8] sm:$0xff] %v144_v34  ;;  %v146_v38 = vmul.f32 %v143_v37, %v448_v31 }
  0x46   :  { %148 = vst [vmem:[#allocation8 + $0x8] sm:$0xff] %v145_v36 }
  0x47   :  { %149 = vst [vmem:[#allocation8 + $0x10] sm:$0xff] %v146_v38 }
  0x48   :  { %196 = dma.vmem_to_hbm [thread:$0]  %s192_s14, 384, %s194_s17, [#allocation4]  }
  0x49   :  { %395 = dma.done.wait [#allocation4], 384  }
  0x4a   :  { %396 = vsyncadd [#allocation4], 4294966912 }
  0x4b   :  { %397 = dma.done.wait [#allocation10], 96  }
  0x4c   :  { %398 = vsyncadd [#allocation10], 4294967200 }
  0x4d   :  { %231 = vsyncpa [#allocation3], 1 }
  0x4e   :  { %232 = vsyncpa [#allocation6], 1 }
  0x4f   :  { %233 = vsyncpa [#allocation4], 1 }
  0x50   :  { %234 = vsyncpa [#allocation10], 1 }

</bundles_post_ra>
